<compile_context>
chip_gen: v6e
topology: v6e:2x2x1
jax: 0.10.0
libtpu: 0.0.40
codegen_flags: <defaults>
</compile_context>

<pallas_src>
import functools

import jax
import jax.numpy as jnp
from jax.experimental import pallas as pl
from jax.experimental.pallas import tpu as pltpu

LANE = 128
VMEM_SPEC = pl.BlockSpec(memory_space=pltpu.MemorySpace.VMEM)


# ----------------------------------------------------------------------------
# small helpers
# ----------------------------------------------------------------------------
def _rpad(n):
    return ((int(n) + LANE - 1) // LANE) * LANE


def _pad1(v, n):
    return jnp.pad(v, (0, n - v.shape[0]))


def _pad2(w, r, c):
    return jnp.pad(w, ((0, r - w.shape[0]), (0, c - w.shape[1])))


def _pick_tile(n, cands=(512, 256, 128, 64, 32, 16, 8)):
    for t in cands:
        if n >= t and n % t == 0:
            return t
    return n  # whole extent (always legal as a full-dim block)


def _apply_act(y, act):
    if act == "relu6":
        return jnp.clip(y, 0.0, 6.0)
    if act == "relu":
        return jnp.maximum(y, 0.0)
    if act == "sigmoid":
        return jax.nn.sigmoid(y)
    return y


# ----------------------------------------------------------------------------
# Pallas kernels
# ----------------------------------------------------------------------------
def _mm_affine_kernel(x_ref, w_ref, s_ref, b_ref, o_ref, *, act):
    # y = act((x @ w) * scale + bias)   -- fused 1x1x1 conv / Linear + BN + act
    y = jnp.dot(x_ref[...], w_ref[...], preferred_element_type=jnp.float32)
    y = y * s_ref[0, :] + b_ref[0, :]
    o_ref[...] = _apply_act(y, act).astype(o_ref.dtype)


def matmul_affine(x, w, scale, bias, act="none", out_dtype=jnp.bfloat16):
    """x: [M, K] bf16, w: [K, N] bf16, scale/bias: [N] f32 -> [M, N]."""
    M, K = x.shape
    Nout = w.shape[1]
    TM = _pick_tile(M)
    kern = functools.partial(_mm_affine_kernel, act=act)
    return pl.pallas_call(
        kern,
        out_shape=jax.ShapeDtypeStruct((M, Nout), out_dtype),
        grid=(M // TM,),
        in_specs=[
            pl.BlockSpec((TM, K), lambda i: (i, 0)),
            pl.BlockSpec((K, Nout), lambda i: (0, 0)),
            pl.BlockSpec((1, Nout), lambda i: (0, 0)),
            pl.BlockSpec((1, Nout), lambda i: (0, 0)),
        ],
        out_specs=pl.BlockSpec((TM, Nout), lambda i: (i, 0)),
        compiler_params=pltpu.CompilerParams(dimension_semantics=("parallel",)),
    )(x, w, scale.reshape(1, Nout), bias.reshape(1, Nout))


def _mm_bias_kernel(x_ref, w_ref, b_ref, o_ref, *, act):
    y = jnp.dot(x_ref[...], w_ref[...], preferred_element_type=jnp.float32)
    y = y + b_ref[0, :]
    o_ref[...] = _apply_act(y, act).astype(o_ref.dtype)


def matmul_bias(x, w, b, act="none", out_dtype=jnp.float32):
    """Bias-only Linear (no dummy scale), row-tiled."""
    M, K = x.shape
    Nout = w.shape[1]
    TM = _pick_tile(M)
    kern = functools.partial(_mm_bias_kernel, act=act)
    return pl.pallas_call(
        kern,
        out_shape=jax.ShapeDtypeStruct((M, Nout), out_dtype),
        grid=(M // TM,),
        in_specs=[
            pl.BlockSpec((TM, K), lambda i: (i, 0)),
            pl.BlockSpec((K, Nout), lambda i: (0, 0)),
            pl.BlockSpec((1, Nout), lambda i: (0, 0)),
        ],
        out_specs=pl.BlockSpec((TM, Nout), lambda i: (i, 0)),
        compiler_params=pltpu.CompilerParams(dimension_semantics=("parallel",)),
    )(x, w, b.reshape(1, Nout))


def _dw_kernel(x_ref, w_ref, s_ref, b_ref, y_ref, sum_ref, *, k, s):
    # Depthwise 3-D conv with the stride resolved through a parity (space-to-
    # batch) decomposition of the padded input, fused with folded BN + ReLU6
    # and the per-channel spatial sum used by the SE branch.
    #   x_ref:   [1, P*Di, Hi, Wi, TC]   parity-stacked padded input (bf16)
    #   w_ref:   [k^3, TC] f32 ; s_ref/b_ref: [1, TC] f32
    #   y_ref:   [1, Do, Ho, Wo, TC] bf16 ; sum_ref: [1, 1, TC] f32
    _, Do, Ho, Wo, TC = y_ref.shape
    Mh = (k - 1) // s
    Di = Do + Mh
    acc = jnp.zeros((Do, Ho, Wo, TC), jnp.float32)
    for kd in range(k):
        for kh in range(k):
            for kw in range(k):
                p_idx = (kd % s) * s * s + (kh % s) * s + (kw % s)
                md, mh, mw = kd // s, kh // s, kw // s
                tap = x_ref[0,
                            p_idx * Di + md: p_idx * Di + md + Do,
                            mh: mh + Ho,
                            mw: mw + Wo, :].astype(jnp.float32)
                acc = acc + tap * w_ref[kd * k * k + kh * k + kw, :]
    y = acc * s_ref[0, :] + b_ref[0, :]
    y = jnp.clip(y, 0.0, 6.0)
    y_ref[0] = y.astype(y_ref.dtype)
    sum_ref[0, 0, :] = jnp.sum(y, axis=(0, 1, 2))


def dw_conv_bn_relu6(h, w, scale, bias, k, s):
    """h: [N, D, H, W, C] bf16 -> (y [N, Do, Ho, Wo, C] bf16, chan_sum [N,1,C] f32)."""
    N, D, H, W, C = h.shape
    p = (k - 1) // 2
    Do = (D + 2 * p - k) // s + 1
    Ho = (H + 2 * p - k) // s + 1
    Wo = (W + 2 * p - k) // s + 1
    Mh = (k - 1) // s
    Di, Hi, Wi = Do + Mh, Ho + Mh, Wo + Mh
    # TODO(synk): the halo pad + parity split is done by XLA as one rearrangement
    # pass; for very large volumes also tile D/H inside the kernel (manual halo DMA).
    xp = jnp.pad(h, ((0, 0),
                     (p, s * Di - D - p),
                     (p, s * Hi - H - p),
                     (p, s * Wi - W - p),
                     (0, 0)))
    if s == 1:
        xcat = xp                                  # [N, Di, Hi, Wi, C]
        P = 1
    else:
        parts = [xp[:, rd::s, rh::s, rw::s, :]
                 for rd in range(s) for rh in range(s) for rw in range(s)]
        xcat = jnp.concatenate(parts, axis=1)      # [N, P*Di, Hi, Wi, C]
        P = s ** 3

    CT = C // LANE
    kern = functools.partial(_dw_kernel, k=k, s=s)
    y, csum = pl.pallas_call(
        kern,
        out_shape=(jax.ShapeDtypeStruct((N, Do, Ho, Wo, C), jnp.bfloat16),
                   jax.ShapeDtypeStruct((N, 1, C), jnp.float32)),
        grid=(N, CT),
        in_specs=[
            pl.BlockSpec((1, P * Di, Hi, Wi, LANE), lambda n, ct: (n, 0, 0, 0, ct)),
            pl.BlockSpec((k * k * k, LANE), lambda n, ct: (0, ct)),
            pl.BlockSpec((1, LANE), lambda n, ct: (0, ct)),
            pl.BlockSpec((1, LANE), lambda n, ct: (0, ct)),
        ],
        out_specs=(
            pl.BlockSpec((1, Do, Ho, Wo, LANE), lambda n, ct: (n, 0, 0, 0, ct)),
            pl.BlockSpec((1, 1, LANE), lambda n, ct: (n, 0, ct)),
        ),
        compiler_params=pltpu.CompilerParams(
            dimension_semantics=("parallel", "parallel")),
    )(xcat, w, scale.reshape(1, C), bias.reshape(1, C))
    return y, csum


def _se_gate_kernel(s_ref, w1_ref, b1_ref, w2_ref, b2_ref, o_ref, *, inv_s):
    # gate = sigmoid(relu(mean(y) @ W1 + b1) @ W2 + b2)   (whole SE excitation)
    pooled = (s_ref[:, 0, :] * inv_s).astype(jnp.bfloat16)          # [N, C]
    r = jnp.dot(pooled, w1_ref[...], preferred_element_type=jnp.float32) + b1_ref[0, :]
    r = jnp.maximum(r, 0.0).astype(jnp.bfloat16)
    g = jnp.dot(r, w2_ref[...], preferred_element_type=jnp.float32) + b2_ref[0, :]
    o_ref[:, 0, :] = jax.nn.sigmoid(g)


def se_gate(chan_sum, w1, b1, w2, b2, inv_s):
    """chan_sum: [N, 1, C] f32 -> gate [N, 1, C] f32 (tiny, whole-array)."""
    N, _, C = chan_sum.shape
    red = w1.shape[1]
    kern = functools.partial(_se_gate_kernel, inv_s=inv_s)
    return pl.pallas_call(
        kern,
        out_shape=jax.ShapeDtypeStruct((N, 1, C), jnp.float32),
        in_specs=[VMEM_SPEC] * 5,
        out_specs=VMEM_SPEC,
    )(chan_sum, w1, b1.reshape(1, red), w2, b2.reshape(1, C))


def _seproj_kernel(y_ref, g_ref, w_ref, s_ref, b_ref, o_ref):
    y = y_ref[0].astype(jnp.float32) * g_ref[0, 0, :]
    out = jnp.dot(y.astype(jnp.bfloat16), w_ref[...],
                  preferred_element_type=jnp.float32)
    out = out * s_ref[0, :] + b_ref[0, :]
    o_ref[0] = out.astype(o_ref.dtype)


def _seproj_res_kernel(y_ref, g_ref, w_ref, s_ref, b_ref, id_ref, o_ref):
    y = y_ref[0].astype(jnp.float32) * g_ref[0, 0, :]
    out = jnp.dot(y.astype(jnp.bfloat16), w_ref[...],
                  preferred_element_type=jnp.float32)
    out = out * s_ref[0, :] + b_ref[0, :] + id_ref[0].astype(jnp.float32)
    o_ref[0] = out.astype(o_ref.dtype)


def se_scale_proj(y3, gate, w, scale, bias, identity=None):
    """Fused: (y * SE-gate) @ Wproj * bn_scale + bn_bias (+ residual).

    y3: [N, S, C] bf16, gate: [N, 1, C] f32, w: [C, Cout] bf16,
    identity: [N, S, Cout] bf16 or None -> [N, S, Cout] bf16.
    """
    N, S, C = y3.shape
    Cout = w.shape[1]
    TS = _pick_tile(S)
    ST = S // TS
    args = [y3, gate, w, scale.reshape(1, Cout), bias.reshape(1, Cout)]
    in_specs = [
        pl.BlockSpec((1, TS, C), lambda n, st: (n, st, 0)),
        pl.BlockSpec((1, 1, C), lambda n, st: (n, 0, 0)),
        pl.BlockSpec((C, Cout), lambda n, st: (0, 0)),
        pl.BlockSpec((1, Cout), lambda n, st: (0, 0)),
        pl.BlockSpec((1, Cout), lambda n, st: (0, 0)),
    ]
    if identity is not None:
        args.append(identity)
        in_specs.append(pl.BlockSpec((1, TS, Cout), lambda n, st: (n, st, 0)))
        kern = _seproj_res_kernel
    else:
        kern = _seproj_kernel
    return pl.pallas_call(
        kern,
        out_shape=jax.ShapeDtypeStruct((N, S, Cout), jnp.bfloat16),
        grid=(N, ST),
        in_specs=in_specs,
        out_specs=pl.BlockSpec((1, TS, Cout), lambda n, st: (n, st, 0)),
        compiler_params=pltpu.CompilerParams(
            dimension_semantics=("parallel", "parallel")),
    )(*args)


def _head_pool_kernel(x_ref, w_ref, s_ref, b_ref, o_ref, acc_ref, *, inv_s):
    # head 1x1x1 conv + BN + ReLU6 fused with global average pooling; the mean
    # is accumulated in a resident [1, Cout] scratch, finalized per batch row.
    n = pl.program_id(0)
    st = pl.program_id(1)

    @pl.when(st == 0)
    def _():
        acc_ref[...] = jnp.zeros_like(acc_ref)

    y = jnp.dot(x_ref[0], w_ref[...], preferred_element_type=jnp.float32)
    y = jnp.clip(y * s_ref[0, :] + b_ref[0, :], 0.0, 6.0)
    acc_ref[...] += jnp.sum(y, axis=0, keepdims=True)

    @pl.when(st == pl.num_programs(1) - 1)
    def _():
        o_ref[pl.ds(n, 1), :] = acc_ref[...] * inv_s


def head_conv_pool(x3, w, scale, bias):
    """x3: [N, S, Cin] bf16 -> pooled head activation [N, Cout] f32."""
    N, S, Cin = x3.shape
    Cout = w.shape[1]
    TS = _pick_tile(S)
    ST = S // TS
    kern = functools.partial(_head_pool_kernel, inv_s=1.0 / S)
    return pl.pallas_call(
        kern,
        out_shape=jax.ShapeDtypeStruct((N, Cout), jnp.float32),
        grid=(N, ST),
        in_specs=[
            pl.BlockSpec((1, TS, Cin), lambda n, st: (n, st, 0)),
            pl.BlockSpec((Cin, Cout), lambda n, st: (0, 0)),
            pl.BlockSpec((1, Cout), lambda n, st: (0, 0)),
            pl.BlockSpec((1, Cout), lambda n, st: (0, 0)),
        ],
        out_specs=pl.BlockSpec((N, Cout), lambda n, st: (0, 0)),
        scratch_shapes=[pltpu.VMEM((1, Cout), jnp.float32)],
        compiler_params=pltpu.CompilerParams(
            dimension_semantics=("arbitrary", "arbitrary")),
    )(x3, w, scale.reshape(1, Cout), bias.reshape(1, Cout))


# ----------------------------------------------------------------------------
# Parameter initialization (deterministic, synthetic; channels zero-padded to 128)
# ----------------------------------------------------------------------------
def _bn_fold(key, c, eps=1e-5):
    k1, k2, k3, k4 = jax.random.split(key, 4)
    gamma = 1.0 + 0.1 * jax.random.normal(k1, (c,), jnp.float32)
    beta = 0.05 * jax.random.normal(k2, (c,), jnp.float32)
    mean = 0.05 * jax.random.normal(k3, (c,), jnp.float32)
    var = 1.0 + 0.1 * jax.random.uniform(k4, (c,), jnp.float32)
    scale = gamma / jnp.sqrt(var + eps)
    bias = beta - mean * scale
    return scale, bias


def init_params(key, num_demographics=3, initial_filters=32, width_coefficient=1.0,
                depth_coefficient=1.0, filters_multiplier=1.2, use_demographics=False):
    initial_filters = int(initial_filters * width_coefficient)
    last_filters = int(1280 * width_coefficient)
    blocks_config = [
        (int(16 * width_coefficient * filters_multiplier), 1, int(1 * depth_coefficient), 1, 3, True),
        (int(24 * width_coefficient * filters_multiplier), 6, int(2 * depth_coefficient), 2, 3, True),
        (int(40 * width_coefficient * filters_multiplier), 6, int(2 * depth_coefficient), 2, 5, True),
        (int(80 * width_coefficient * filters_multiplier), 6, int(3 * depth_coefficient), 2, 3, True),
        (int(112 * width_coefficient * filters_multiplier), 6, int(3 * depth_coefficient), 1, 5, True),
        (int(192 * width_coefficient * filters_multiplier), 6, int(4 * depth_coefficient), 2, 5, True),
        (int(320 * width_coefficient * filters_multiplier), 6, int(1 * depth_coefficient), 1, 3, True),
    ]

    keys = iter(jax.random.split(key, 4096))

    def nk():
        return next(keys)

    def conv_w(shape, fan_in):
        return jax.random.normal(nk(), shape, jnp.float32) / jnp.sqrt(float(fan_in))

    params = {"use_demographics": use_demographics}

    # stem: Conv3d(1, C0, 3, stride=2, pad=1) stored tap-major [27, C0p]
    c0a, c0p = initial_filters, _rpad(initial_filters)
    s_, b_ = _bn_fold(nk(), c0a)
    params["stem"] = dict(
        w=_pad2(conv_w((27, c0a), 27), 27, c0p).astype(jnp.bfloat16),
        scale=_pad1(s_, c0p), bias=_pad1(b_, c0p))

    blocks = []
    in_a, in_p = c0a, c0p
    for out_a, exp_ratio, num_layers, stride, k, use_se in blocks_config:
        out_a = int(out_a)
        out_p = _rpad(out_a)
        for i in range(num_layers):
            blk_stride = stride if i == 0 else 1
            hid_a = int(in_a * exp_ratio)
            hid_p = _rpad(hid_a)
            bp = dict(k=k, stride=blk_stride,
                      use_residual=(blk_stride == 1 and in_a == out_a))
            if exp_ratio != 1:
                es, eb = _bn_fold(nk(), hid_a)
                bp["expand"] = dict(
                    w=_pad2(conv_w((in_a, hid_a), in_a), in_p, hid_p).astype(jnp.bfloat16),
                    scale=_pad1(es, hid_p), bias=_pad1(eb, hid_p))
            else:
                bp["expand"] = None
            ds_, db_ = _bn_fold(nk(), hid_a)
            bp["dw"] = dict(
                w=_pad2(conv_w((k * k * k, hid_a), k * k * k), k * k * k, hid_p),
                scale=_pad1(ds_, hid_p), bias=_pad1(db_, hid_p))
            if use_se:
                red_a = max(hid_a // 4, 1)     # SEBlock3D(hidden, reduction=4)
                red_p = _rpad(red_a)
                bp["se"] = dict(
                    w1=_pad2(conv_w((hid_a, red_a), hid_a), hid_p, red_p).astype(jnp.bfloat16),
                    b1=_pad1(0.01 * jax.random.normal(nk(), (red_a,), jnp.float32), red_p),
                    w2=_pad2(conv_w((red_a, hid_a), red_a), red_p, hid_p).astype(jnp.bfloat16),
                    b2=_pad1(0.01 * jax.random.normal(nk(), (hid_a,), jnp.float32), hid_p))
            else:
                bp["se"] = None
            ps_, pb_ = _bn_fold(nk(), out_a)
            bp["proj"] = dict(
                w=_pad2(conv_w((hid_a, out_a), hid_a), hid_p, out_p).astype(jnp.bfloat16),
                scale=_pad1(ps_, out_p), bias=_pad1(pb_, out_p))
            blocks.append(bp)
            in_a, in_p = out_a, out_p
    params["blocks"] = blocks

    last_p = _rpad(last_filters)
    hs_, hb_ = _bn_fold(nk(), last_filters)
    params["head"] = dict(
        w=_pad2(conv_w((in_a, last_filters), in_a), in_p, last_p).astype(jnp.bfloat16),
        scale=_pad1(hs_, last_p), bias=_pad1(hb_, last_p))
    params["fc"] = dict(
        w=_pad2(conv_w((last_filters, 128), last_filters), last_p, 128).astype(jnp.bfloat16),
        b=0.01 * jax.random.normal(nk(), (128,), jnp.float32))
    fc_out_in = 128 + num_demographics if use_demographics else 128
    params["fc_out"] = dict(
        w=conv_w((fc_out_in, 1), fc_out_in).astype(jnp.bfloat16),
        b=0.01 * jax.random.normal(nk(), (1,), jnp.float32))
    return params


# ----------------------------------------------------------------------------
# Forward pass
# ----------------------------------------------------------------------------
def mbconv_forward(bp, x):
    """One MBConvBlock3D. x: [N, D, H, W, Cin_p] bf16 channels-last."""
    N, D, H, W, Cin = x.shape
    identity = x
    h = x
    if bp["expand"] is not None:
        e = bp["expand"]
        h = matmul_affine(h.reshape(-1, Cin), e["w"], e["scale"], e["bias"],
                          act="relu6").reshape(N, D, H, W, -1)
    C = h.shape[-1]

    # depthwise conv (stride computed directly) + BN + ReLU6 + SE channel sums
    dw = bp["dw"]
    y, csum = dw_conv_bn_relu6(h, dw["w"], dw["scale"], dw["bias"],
                               bp["k"], bp["stride"])
    _, Do, Ho, Wo, _ = y.shape
    S = Do * Ho * Wo

    # Squeeze-and-Excitation gate (pool -> FC1 relu -> FC2 sigmoid), one kernel
    if bp["se"] is not None:
        se = bp["se"]
        gate = se_gate(csum, se["w1"], se["b1"], se["w2"], se["b2"], inv_s=1.0 / S)
    else:
        gate = jnp.ones((N, 1, C), jnp.float32)

    # fused SE-scale + projection 1x1x1 conv + BN (+ residual)
    p = bp["proj"]
    Cout = p["w"].shape[1]
    ident = identity.reshape(N, S, Cout) if bp["use_residual"] else None
    out = se_scale_proj(y.reshape(N, S, C), gate, p["w"], p["scale"], p["bias"], ident)
    return out.reshape(N, Do, Ho, Wo, Cout)


def efficientnet3d_forward(params, x, demographics):
    """x: [N, 1, D, H, W] (PyTorch NCDHW); demographics: [N, num_demographics]."""
    N, _, D, H, W = x.shape
    xs = x[:, 0]                                           # [N, D, H, W], 1 channel

    # stem: 3x3x3 conv, stride 2, pad 1 via im2col (bf16) + fused matmul/BN/ReLU6.
    # TODO(synk): patch extraction is still XLA-side; move the 27-tap gather
    # in-kernel for very large volumes to avoid the HBM im2col materialization.
    xp = jnp.pad(xs, ((0, 0), (1, 1), (1, 1), (1, 1))).astype(jnp.bfloat16)
    Do = (D + 2 - 3) // 2 + 1
    Ho = (H + 2 - 3) // 2 + 1
    Wo = (W + 2 - 3) // 2 + 1
    cols = [xp[:, kd:kd + 2 * Do - 1:2, kh:kh + 2 * Ho - 1:2, kw:kw + 2 * Wo - 1:2]
            for kd in range(3) for kh in range(3) for kw in range(3)]
    col = jnp.stack(cols, axis=-1).reshape(N * Do * Ho * Wo, 27)
    st = params["stem"]
    h = matmul_affine(col, st["w"], st["scale"], st["bias"], act="relu6")
    h = h.reshape(N, Do, Ho, Wo, -1)

    for bp in params["blocks"]:
        h = mbconv_forward(bp, h)

    # head 1x1x1 conv + BN + ReLU6 fused with AdaptiveAvgPool3d((1,1,1))
    Nn, Dd, Hd, Wd, C = h.shape
    hd = params["head"]
    pooled = head_conv_pool(h.reshape(N, Dd * Hd * Wd, C),
                            hd["w"], hd["scale"], hd["bias"])        # [N, 1280] f32

    # TODO(synk): nn.Dropout(0.2) is identity at inference; training dropout not implemented.
    fc = params["fc"]
    f = matmul_bias(pooled.astype(jnp.bfloat16), fc["w"], fc["b"])   # [N, 128] f32
    if params["use_demographics"]:
        f = jnp.concatenate([f, demographics], axis=1)
    fo = params["fc_out"]
    out = matmul_bias(f.astype(jnp.bfloat16), fo["w"], fo["b"])      # [N, 1] f32
    return out


# ----------------------------------------------------------------------------
if __name__ == "__main__":
    key = jax.random.PRNGKey(0)
    kp, kx, kd = jax.random.split(key, 3)

    params = init_params(kp, num_demographics=3, use_demographics=False)

    N = 2
    x = jax.random.normal(kx, (N, 1, 16, 16, 16), jnp.float32)
    demographics = jax.random.normal(kd, (N, 3), jnp.float32)

    out = efficientnet3d_forward(params, x, demographics)
    out = jax.block_until_ready(out)
    assert out.shape == (N, 1), out.shape
    assert bool(jnp.all(jnp.isfinite(out)))
    print("KERNEL_OK")
</pallas_src>

<mosaic_0001>
module attributes {stable_mosaic.version = 11 : i64} {
  func.func @_mm_affine_kernel(%arg0: i32, %arg1: memref<512x27xbf16, #tpu.memory_space<vmem>>, %arg2: memref<27x128xbf16, #tpu.memory_space<vmem>>, %arg3: memref<1x128xf32, #tpu.memory_space<vmem>>, %arg4: memref<1x128xf32, #tpu.memory_space<vmem>>, %arg5: memref<512x128xbf16, #tpu.memory_space<vmem>>) attributes {dimension_semantics = [#tpu.dimension_semantics<parallel>], iteration_bounds = array<i64: 2>, scalar_prefetch = 0 : i64, scratch_operands = 0 : i64, tpu.core_type = #tpu.core_type<tc>, window_params = [{transform_indices = @transform_0, window_bounds = array<i64: 512, 27>}, {pipeline_mode = #tpu.pipeline_mode<synchronous>, transform_indices = @transform_1, window_bounds = array<i64: 27, 128>}, {pipeline_mode = #tpu.pipeline_mode<synchronous>, transform_indices = @transform_2, window_bounds = array<i64: 1, 128>}, {pipeline_mode = #tpu.pipeline_mode<synchronous>, transform_indices = @transform_3, window_bounds = array<i64: 1, 128>}, {transform_indices = @transform_4, window_bounds = array<i64: 512, 128>}]} {
    %c0 = arith.constant 0 : index
    %c0_0 = arith.constant 0 : index
    %0 = vector.load %arg1[%c0, %c0_0] : memref<512x27xbf16, #tpu.memory_space<vmem>>, vector<512x27xbf16>
    %c0_1 = arith.constant 0 : index
    %c0_2 = arith.constant 0 : index
    %1 = vector.load %arg2[%c0_1, %c0_2] : memref<27x128xbf16, #tpu.memory_space<vmem>>, vector<27x128xbf16>
    %cst = arith.constant dense<0.000000e+00> : vector<512x128xf32>
    %2 = tpu.matmul %0, %1, %cst {dimension_numbers = #tpu.dot_dimension_numbers<[1], [0], [0], [1], [0, 0, 1, 1], [], []>} : vector<512x27xbf16>, vector<27x128xbf16>, vector<512x128xf32> -> vector<512x128xf32>
    %c0_3 = arith.constant 0 : index
    %c0_4 = arith.constant 0 : index
    %3 = vector.load %arg3[%c0_3, %c0_4] : memref<1x128xf32, #tpu.memory_space<vmem>>, vector<1x128xf32>
    %4 = vector.shape_cast %3 : vector<1x128xf32> to vector<128xf32>
    %5 = vector.shape_cast %4 : vector<128xf32> to vector<1x128xf32>
    %6 = vector.broadcast %5 : vector<1x128xf32> to vector<512x128xf32>
    %7 = arith.mulf %2, %6 : vector<512x128xf32>
    %c0_5 = arith.constant 0 : index
    %c0_6 = arith.constant 0 : index
    %8 = vector.load %arg4[%c0_5, %c0_6] : memref<1x128xf32, #tpu.memory_space<vmem>>, vector<1x128xf32>
    %9 = vector.shape_cast %8 : vector<1x128xf32> to vector<128xf32>
    %10 = vector.shape_cast %9 : vector<128xf32> to vector<1x128xf32>
    %11 = vector.broadcast %10 : vector<1x128xf32> to vector<512x128xf32>
    %12 = arith.addf %7, %11 : vector<512x128xf32>
    %cst_7 = arith.constant 0.000000e+00 : f32
    %cst_8 = arith.constant 6.000000e+00 : f32
    %13 = vector.broadcast %cst_7 : f32 to vector<512x128xf32>
    %14 = arith.maximumf %13, %12 : vector<512x128xf32>
    %15 = vector.broadcast %cst_8 : f32 to vector<512x128xf32>
    %16 = arith.minimumf %15, %14 : vector<512x128xf32>
    %17 = arith.truncf %16 : vector<512x128xf32> to vector<512x128xbf16>
    %c0_9 = arith.constant 0 : index
    %c0_10 = arith.constant 0 : index
    %18 = vector.load %arg5[%c0_9, %c0_10] : memref<512x128xbf16, #tpu.memory_space<vmem>>, vector<512x128xbf16>
    tpu.vector_store %arg5[%c0_9, %c0_10], %17 {strides = array<i32>} : memref<512x128xbf16, #tpu.memory_space<vmem>>, vector<512x128xbf16>,
    return
  }
  func.func @transform_0(%arg0: i32) -> (i32, i32) {
    %c0_i32 = arith.constant 0 : i32
    %c0_i32_0 = arith.constant 0 : i32
    return %arg0, %c0_i32 : i32, i32
  }
  func.func @transform_1(%arg0: i32) -> (i32, i32) {
    %c0_i32 = arith.constant 0 : i32
    %c0_i32_0 = arith.constant 0 : i32
    %c0_i32_1 = arith.constant 0 : i32
    return %c0_i32, %c0_i32_0 : i32, i32
  }
  func.func @transform_2(%arg0: i32) -> (i32, i32) {
    %c0_i32 = arith.constant 0 : i32
    %c0_i32_0 = arith.constant 0 : i32
    %c0_i32_1 = arith.constant 0 : i32
    return %c0_i32, %c0_i32_0 : i32, i32
  }
  func.func @transform_3(%arg0: i32) -> (i32, i32) {
    %c0_i32 = arith.constant 0 : i32
    %c0_i32_0 = arith.constant 0 : i32
    %c0_i32_1 = arith.constant 0 : i32
    return %c0_i32, %c0_i32_0 : i32, i32
  }
  func.func @transform_4(%arg0: i32) -> (i32, i32) {
    %c0_i32 = arith.constant 0 : i32
    %c0_i32_0 = arith.constant 0 : i32
    return %arg0, %c0_i32 : i32, i32
  }
}

</mosaic_0001>

<bundles_post_ra>
// kernel: tpu_custom_call.1
= control target key start
LH: loop header
LB: loop body
LE: loop exit
PB: predicated region body
PF: predicated region fallthrough
CT: control target
= control target key end

     0   :  { %9 = vsyncpa [#allocation3], 0  ;;  %s2521_s0 = inlined_call_operand.vmem [shape: bf16[1024,27], index: 0, kind: input, shape index: {}]   ;;  %s2522_s1 = inlined_call_operand.vmem [shape: bf16[27,128], index: 1, kind: input, shape index: {}]   ;;  %s2523_s2 = inlined_call_operand.vmem [shape: f32[1,128], index: 2, kind: input, shape index: {}]   ;;  %s2524_s3 = inlined_call_operand.vmem [shape: f32[1,128], index: 3, kind: input, shape index: {}]   ;;  %s2525_s4 = inlined_call_operand.hbm [shape: bf16[1024,128], index: 4, kind: output, shape index: {}]  }
   0x1   :  { %11 = vsyncpa [#allocation3 + $0x1], 0  ;;  %s2171_s15 = smov 0   ;;  %s2173_s16 = smov 0  }
   0x2   :  { %s2175_s17 = smov 0   ;;  %s2177_s18 = smov 0  }
   0x3 LB: > { %s2192_s19 = sadd.s32 4294967295, %s2140_s18   ;;  %s1498_s20 = sadd.s32 4294967294, %s2140_s18   ;;  %s2140_s18 = sphi %s2177_s18, %s2531_s18   ;;  %s2136_s17 = sphi %s2175_s17, %s2530_s17   ;;  %s2132_s16 = sphi %s2173_s16, %s2529_s16   ;;  %s2128_s15 = sphi %s2171_s15, %s2528_s15  }
   0x4   : > { %s2196_s21 = sadd.s32 1, %s2140_s18   ;;  %s113_s22 = sadd.s32 1, %s2136_s17 }
   0x5   : > { %s110_s23 = ssub.s32 %s2140_s18, %s2196_s21  ;;  %p123_p0 = scmp.ne.s32.totalorder %s2136_s17, %s2132_s16 }
   0x6   : > { %p111_p1 = scmp.eq.s32.totalorder %s110_s23, 0  ;;  %p124_p2 = scmp.eq.s32.totalorder %s2192_s19, 1 }
   0x7   : > { %p129_p3 = scmp.ne.s32.totalorder %s2132_s16, %s2128_s15  ;;  %p130_p4 = scmp.eq.s32.totalorder %s1498_s20, 1 }
   0x8   : > { %s2207_s24 = scalar_select %p111_p1, %s2136_s17, %s113_s22  }
   0x9   : > { %p2209_p5 = por %p124_p2, %p123_p0  ;;  %p2213_p6 = por %p130_p4, %p129_p3 }
   0xa   : > { %p1501_p7 = scmp.ge.s32.totalorder %s2140_s18, 1  ;;  %p166_p8 = scmp.lt.s32.totalorder %s2140_s18, 3 }
   0xc   : > { %p167_p9 = pnand %p1501_p7, %p166_p8 }
   0xd   : > { %s1503_s29 = sshll.u32 (!%p167_p9), %s2192_s19, 6  ;;  %s189_s14 = sand.u32 (!%p167_p9), 1, %s2132_s16  }
   0xe   : > { %170 = sbr.rel (%p167_p9) target bundleno = 318 (0x13e), region = 36  ;;  %p193_p10 = scmp.lt.s32.totalorder (!%p167_p9), %s1503_s29, 127 }
   0xf   : > { %s1502_s20 = sshll.u32 (!%p167_p9), %s189_s14, 8  ;;  %s1706_s23 = sshll.u32 (!%p167_p9), %s2192_s19, 12 }
  0x10   : > { %s2332_s22 = scalar_lea.vmem (!%p167_p9), [#allocation2], %s1502_s20  ;;  %s2471_s30 = scalar_lea.hbm (!%p167_p9), %s2525_s4, %s1706_s23 }
  0x11   : > { %s1436_s27 = sshll.u32 (!%p167_p9), %s2332_s22, 4  ;;  %s2481_s19 = scalar_lea.sflag (!%p167_p9), [#allocation3], %s189_s14  ;;  %s2473_s27 = int_to_ptr.vmem [resolvable:$true] %s1436_s27 }
  0x12   : > { %s2080_s5 = scalar_lea.vmem (!%p167_p9), %s2473_s27, 4096 }
  0x13   : > { %v2046_v0 = vld [vmem:[%s2522_s1 + $0x8] sm:$0x3f]   ;;  %vm536_vm0 = vcmask 1044480   ;;  %vm537_vm1 = vcmask 1045504   ;;  %v2142_v1 = vmov 65535   ;;  %v2047_v5 = vld [vmem:[%s2522_s1] sm:$0xff]   ;;  %p2081_p11 = scmp.ne.s32.totalorder %s2473_s27, %s2080_s5 }
  0x14   : > { %v538_v2 = vsel %vm536_vm0, 4294967295, %v2142_v1  ;;  %s2533_s29 = smov (!%p193_p10, %s1503_s29), 127  ;;  %vm439_vm2 = vcmask 220160   ;;  %v2298_v38 = vld [vmem:[%s2523_s2] ss:$0 sm:$0xff] }
  0x15   : > { %v539_v3 = vsel %vm537_vm1, %v538_v2, 0  ;;  %s1504_s6 = sshll.u32 %s2533_s29, 2  ;;  %v2303_v40 = vld [vmem:[%s2524_s3] ss:$0 sm:$0xff]  ;;  %p2082_p12 = pnand %p2081_p11, %p2209_p5 }
  0x16   : > { %v541_v4 = vand.u32 %v2046_v0, %v539_v3  ;;  %s2229_s9 = scalar_lea.vmem %s2521_s0, %s1504_s6  ;;  %s2143_s6 = smov [#allocation2]  }
  0x17   : > { %v2048_v6 = vld [vmem:[%s2229_s9] sm:$0xff]   ;;  %v2050_v8 = vld [vmem:[%s2229_s9 + $0x8] sm:$0xff]   ;;  %v2052_v10 = vld [vmem:[%s2229_s9 + $0x10] sm:$0xff]   ;;  %p2083_p13 = pneg %p2082_p12  ;;  %s2084_s7 = sshll.u32 %s2143_s6, 4  ;;  %s2085_s7 = int_to_ptr.vmem [resolvable:$false] %s2084_s7 }
  0x18   : > { %1932 = vmatprep.subr.bf16.mxu0 %v541_v4  ;;  %2000 = vmatprep.subr.bf16.mxu1 %v541_v4  ;;  %v2049_v7 = vld [vmem:[%s2229_s9 + $0x80] sm:$0xff]   ;;  %v2051_v9 = vld [vmem:[%s2229_s9 + $0x88] sm:$0xff]   ;;  %v2053_v11 = vld [vmem:[%s2229_s9 + $0x90] sm:$0xff]   ;;  %s2086_s8 = scalar_lea.vmem %s2085_s7, 8192  ;;  %p2087_p0 = scmp.lt.s32.totalorder %s2473_s27, %s2085_s7 }
  0x19   : > { %1933 = vmatpush3.bf16.msra.mxu0 %v541_v4  ;;  %2002 = vmatpush3.bf16.msra.mxu1 %v541_v4  ;;  %v2054_v12 = vld [vmem:[%s2229_s9 + $0x18] sm:$0xff]   ;;  %v2056_v14 = vld [vmem:[%s2229_s9 + $0x20] sm:$0xff]   ;;  %v2058_v16 = vld [vmem:[%s2229_s9 + $0x28] sm:$0xff]   ;;  %p2088_p1 = scmp.lt.s32.totalorder %s2086_s8, %s2080_s5 }
  0x1a   : > { %1934 = vmatprep.subr.bf16.mxu0 %v2047_v5  ;;  %2001 = vmatprep.subr.bf16.mxu1 %v2047_v5  ;;  %v2055_v13 = vld [vmem:[%s2229_s9 + $0x98] sm:$0xff]   ;;  %v2057_v15 = vld [vmem:[%s2229_s9 + $0xa0] sm:$0xff]   ;;  %v2059_v17 = vld [vmem:[%s2229_s9 + $0xa8] sm:$0xff]  }
  0x1b   : > { %1936 = vmatprep.mubr.msk.bf16.mxu0 %vm439_vm2, %v2048_v6  ;;  %1968 = vmatprep.mubr.msk.bf16.mxu1 %vm439_vm2, %v2049_v7  ;;  %v2060_v18 = vld [vmem:[%s2229_s9 + $0x30] sm:$0xff]   ;;  %v2062_v20 = vld [vmem:[%s2229_s9 + $0x38] sm:$0xff]   ;;  %v2064_v22 = vld [vmem:[%s2229_s9 + $0x40] sm:$0xff]   ;;  %p2089_p2 = por %p2088_p1, %p2087_p0 }
  0x1c   : > { %v2061_v19 = vld [vmem:[%s2229_s9 + $0xb0] sm:$0xff]   ;;  %v2063_v21 = vld [vmem:[%s2229_s9 + $0xb8] sm:$0xff]   ;;  %v2065_v23 = vld [vmem:[%s2229_s9 + $0xc0] sm:$0xff]  }
  0x1d   : > { %1935 = vmatpush3.bf16.msra.mxu0 %v2047_v5  ;;  %2003 = vmatpush3.bf16.msra.mxu1 %v2047_v5  ;;  %v2066_v24 = vld [vmem:[%s2229_s9 + $0x48] sm:$0xff]   ;;  %v2068_v26 = vld [vmem:[%s2229_s9 + $0x50] sm:$0xff]   ;;  %v2070_v28 = vld [vmem:[%s2229_s9 + $0x58] sm:$0xff]   ;;  %p2090_p3 = pnand %p2089_p2, %p2083_p13 }
  0x1e   : > { %v2067_v25 = vld [vmem:[%s2229_s9 + $0xc8] sm:$0xff]   ;;  %v2069_v27 = vld [vmem:[%s2229_s9 + $0xd0] sm:$0xff]   ;;  %v2071_v29 = vld [vmem:[%s2229_s9 + $0xd8] sm:$0xff]  }
  0x1f   : > { %v2072_v30 = vld [vmem:[%s2229_s9 + $0x60] sm:$0xff]   ;;  %v2074_v32 = vld [vmem:[%s2229_s9 + $0x68] sm:$0xff]   ;;  %v2076_v34 = vld [vmem:[%s2229_s9 + $0x70] sm:$0xff]  }
  0x20   : > { %1937 = vmatmul.mubr.msk.bf16.vlgmr.msra.gmra.mxu0 %vm439_vm2, %v2050_v8  ;;  %1969 = vmatmul.mubr.msk.bf16.vlgmr.msra.gmra.mxu1 %vm439_vm2, %v2051_v9  ;;  %v2073_v31 = vld [vmem:[%s2229_s9 + $0xe0] sm:$0xff]   ;;  %v2075_v33 = vld [vmem:[%s2229_s9 + $0xe8] sm:$0xff]   ;;  %v2077_v35 = vld [vmem:[%s2229_s9 + $0xf0] sm:$0xff]  }
  0x21   : > { %1940 = vmatprep.mubr.msk.bf16.mxu0 %vm439_vm2, %v2052_v10  ;;  %1972 = vmatprep.mubr.msk.bf16.mxu1 %vm439_vm2, %v2053_v11  ;;  %v2078_v36 = vld [vmem:[%s2229_s9 + $0x78] sm:$0xff]  }
  0x22   : > { %v2079_v37 = vld [vmem:[%s2229_s9 + $0xf8] sm:$0xff]  }
  0x28   : > { %1941 = vmatmul.mubr.msk.bf16.gmra.mxu0 %vm439_vm2, %v2054_v12  ;;  %1973 = vmatmul.mubr.msk.bf16.gmra.mxu1 %vm439_vm2, %v2055_v13 }
  0x29   : > { %1944 = vmatprep.mubr.msk.bf16.mxu0 %vm439_vm2, %v2056_v14  ;;  %1976 = vmatprep.mubr.msk.bf16.mxu1 %vm439_vm2, %v2057_v15 }
  0x30   : > { %1945 = vmatmul.mubr.msk.bf16.gmra.mxu0 %vm439_vm2, %v2058_v16  ;;  %1977 = vmatmul.mubr.msk.bf16.gmra.mxu1 %vm439_vm2, %v2059_v17 }
  0x31   : > { %1948 = vmatprep.mubr.msk.bf16.mxu0 %vm439_vm2, %v2060_v18  ;;  %1980 = vmatprep.mubr.msk.bf16.mxu1 %vm439_vm2, %v2061_v19 }
  0x38   : > { %1949 = vmatmul.mubr.msk.bf16.gmra.mxu0 %vm439_vm2, %v2062_v20  ;;  %1981 = vmatmul.mubr.msk.bf16.gmra.mxu1 %vm439_vm2, %v2063_v21 }
  0x39   : > { %1952 = vmatprep.mubr.msk.bf16.mxu0 %vm439_vm2, %v2064_v22  ;;  %1984 = vmatprep.mubr.msk.bf16.mxu1 %vm439_vm2, %v2065_v23 }
  0x40   : > { %1953 = vmatmul.mubr.msk.bf16.gmra.mxu0 %vm439_vm2, %v2066_v24  ;;  %1985 = vmatmul.mubr.msk.bf16.gmra.mxu1 %vm439_vm2, %v2067_v25 }
  0x41   : > { %1956 = vmatprep.mubr.msk.bf16.mxu0 %vm439_vm2, %v2068_v26  ;;  %1988 = vmatprep.mubr.msk.bf16.mxu1 %vm439_vm2, %v2069_v27 }
  0x48   : > { %1957 = vmatmul.mubr.msk.bf16.gmra.mxu0 %vm439_vm2, %v2070_v28  ;;  %1989 = vmatmul.mubr.msk.bf16.gmra.mxu1 %vm439_vm2, %v2071_v29 }
  0x49   : > { %1960 = vmatprep.mubr.msk.bf16.mxu0 %vm439_vm2, %v2072_v30  ;;  %1992 = vmatprep.mubr.msk.bf16.mxu1 %vm439_vm2, %v2073_v31 }
  0x50   : > { %1961 = vmatmul.mubr.msk.bf16.gmra.mxu0 %vm439_vm2, %v2074_v32  ;;  %1993 = vmatmul.mubr.msk.bf16.gmra.mxu1 %vm439_vm2, %v2075_v33 }
  0x51   : > { %1964 = vmatprep.mubr.msk.bf16.mxu0 %vm439_vm2, %v2076_v34  ;;  %1996 = vmatprep.mubr.msk.bf16.mxu1 %vm439_vm2, %v2077_v35 }
  0x58   : > { %1965 = vmatmul.mubr.msk.bf16.gmra.mxu0 %vm439_vm2, %v2078_v36  ;;  %1997 = vmatmul.mubr.msk.bf16.gmra.mxu1 %vm439_vm2, %v2079_v37 }
  0xe0   : > { %v1938_v39 = vpop.f32.mrf.mxu0  ;;  %v1970_v41 = vpop.f32.mrf.mxu1 }
  0xe1   : > { %v841_v42 = vmul.f32 %v1938_v39, %v2298_v38  ;;  %v873_v43 = vmul.f32 %v1970_v41, %v2298_v38 }
  0xe2   : > { %v577_v44 = vpop.f32.mrf.mxu0  ;;  %v705_v45 = vpop.f32.mrf.mxu1 }
  0xe3   : > { %v912_v46 = vadd.f32 %v2303_v40, %v841_v42  ;;  %v944_v47 = vadd.f32 %v2303_v40, %v873_v43  ;;  %v839_v48 = vmul.f32 %v2298_v38, %v577_v44  ;;  %v871_v49 = vmul.f32 %v2298_v38, %v705_v45 }
  0xe4   : > { %v1939_v50 = vpop.f32.mrf.mxu0  ;;  %v1971_v51 = vpop.f32.mrf.mxu1 }
  0xe5   : > { %v976_v52 = vmax.f32 %v912_v46, 0.0  ;;  %v1008_v53 = vmax.f32 %v944_v47, 0.0  ;;  %v910_v54 = vadd.f32 %v2303_v40, %v839_v48  ;;  %v942_v55 = vadd.f32 %v2303_v40, %v871_v49 }
  0xe6   : > { %v842_v56 = vmul.f32 %v1939_v50, %v2298_v38  ;;  %v874_v57 = vmul.f32 %v1971_v51, %v2298_v38  ;;  %v580_v58 = vpop.f32.mrf.mxu0  ;;  %v708_v59 = vpop.f32.mrf.mxu1 }
  0xe7   : > { %v1040_v60 = vmin.f32 %v976_v52, 6.0  ;;  %v1072_v61 = vmin.f32 %v1008_v53, 6.0  ;;  %v840_v0 = vmul.f32 %v2298_v38, %v580_v58  ;;  %v872_v1 = vmul.f32 %v2298_v38, %v708_v59 }
  0xe8   : > { %v913_v62 = vadd.f32 %v2303_v40, %v842_v56  ;;  %v945_v63 = vadd.f32 %v2303_v40, %v874_v57  ;;  %v1942_v2 = vpop.f32.mrf.mxu0  ;;  %v1974_v3 = vpop.f32.mrf.mxu1  ;;  %v974_v4 = vmax.f32 %v910_v54, 0.0  ;;  %v1006_v5 = vmax.f32 %v942_v55, 0.0 }
  0xe9   : > { %v845_v6 = vmul.f32 %v1942_v2, %v2298_v38  ;;  %v877_v7 = vmul.f32 %v1974_v3, %v2298_v38  ;;  %v911_v10 = vadd.f32 %v2303_v40, %v840_v0  ;;  %v943_v11 = vadd.f32 %v2303_v40, %v872_v1 }
  0xea   : > { %v977_v8 = vmax.f32 %v913_v62, 0.0  ;;  %v1009_v9 = vmax.f32 %v945_v63, 0.0  ;;  %v593_v12 = vpop.f32.mrf.mxu0  ;;  %v721_v13 = vpop.f32.mrf.mxu1  ;;  %v1038_v24 = vmin.f32 %v974_v4, 6.0  ;;  %v1070_v25 = vmin.f32 %v1006_v5, 6.0 }
  0xeb   : > { %v916_v14 = vadd.f32 %v2303_v40, %v845_v6  ;;  %v948_v15 = vadd.f32 %v2303_v40, %v877_v7  ;;  %v843_v16 = vmul.f32 %v2298_v38, %v593_v12  ;;  %v875_v17 = vmul.f32 %v2298_v38, %v721_v13 }
  0xec   : > { %v1041_v18 = vmin.f32 %v977_v8, 6.0  ;;  %v1073_v19 = vmin.f32 %v1009_v9, 6.0  ;;  %v975_v20 = vmax.f32 %v911_v10, 0.0  ;;  %v1007_v21 = vmax.f32 %v943_v11, 0.0  ;;  %v1943_v22 = vpop.f32.mrf.mxu0  ;;  %v1975_v23 = vpop.f32.mrf.mxu1 }
  0xed   : > { %v914_v26 = vadd.f32 %v2303_v40, %v843_v16  ;;  %v946_v27 = vadd.f32 %v2303_v40, %v875_v17  ;;  %v980_v34 = vmax.f32 %v916_v14, 0.0  ;;  %v1012_v35 = vmax.f32 %v948_v15, 0.0 }
  0xee   : > { %v1715_v28 = vpack.c.bf16 %v1041_v18, %v1040_v60  ;;  %v1795_v29 = vpack.c.bf16 %v1073_v19, %v1072_v61  ;;  %v1039_v30 = vmin.f32 %v975_v20, 6.0  ;;  %v1071_v31 = vmin.f32 %v1007_v21, 6.0  ;;  %v596_v32 = vpop.f32.mrf.mxu0  ;;  %v724_v33 = vpop.f32.mrf.mxu1 }
  0xef   : > { %v846_v39 = vmul.f32 %v1943_v22, %v2298_v38  ;;  %v878_v41 = vmul.f32 %v1975_v23, %v2298_v38  ;;  %v978_v44 = vmax.f32 %v914_v26, 0.0  ;;  %v1010_v45 = vmax.f32 %v946_v27, 0.0 }
  0xf0   : > { %1867 = vst [vmem:[%s2332_s22 + $0x8] sm:$0xff] %v1715_v28   ;;  %1883 = vst [vmem:[%s2332_s22 + $0x88] sm:$0xff] %v1795_v29   ;;  %v1710_v36 = vpack.c.bf16 %v1039_v30, %v1038_v24  ;;  %v1790_v37 = vpack.c.bf16 %v1071_v31, %v1070_v25  ;;  %v1946_v42 = vpop.f32.mrf.mxu0  ;;  %v1978_v43 = vpop.f32.mrf.mxu1  ;;  %v844_v46 = vmul.f32 %v2298_v38, %v596_v32  ;;  %v1044_v4 = vmin.f32 %v980_v34, 6.0 }
  0xf1   : > { %v876_v47 = vmul.f32 %v2298_v38, %v724_v33  ;;  %v917_v48 = vadd.f32 %v2303_v40, %v846_v39  ;;  %v949_v49 = vadd.f32 %v2303_v40, %v878_v41  ;;  %v849_v50 = vmul.f32 %v1946_v42, %v2298_v38 }
  0xf2   : > { %1711 = vst [vmem:[%s2332_s22] sm:$0xff] %v1710_v36   ;;  %1882 = vst [vmem:[%s2332_s22 + $0x80] sm:$0xff] %v1790_v37   ;;  %v881_v51 = vmul.f32 %v1978_v43, %v2298_v38  ;;  %v609_v52 = vpop.f32.mrf.mxu0  ;;  %v737_v53 = vpop.f32.mrf.mxu1  ;;  %v915_v54 = vadd.f32 %v2303_v40, %v844_v46  ;;  %v1076_v5 = vmin.f32 %v1012_v35, 6.0  ;;  %v1042_v10 = vmin.f32 %v978_v44, 6.0 }
  0xf3   : > { %v947_v55 = vadd.f32 %v2303_v40, %v876_v47  ;;  %v847_v56 = vmul.f32 %v2298_v38, %v609_v52  ;;  %v879_v57 = vmul.f32 %v2298_v38, %v737_v53  ;;  %v981_v58 = vmax.f32 %v917_v48, 0.0 }
  0xf4   : > { %v1013_v59 = vmax.f32 %v949_v49, 0.0  ;;  %v920_v60 = vadd.f32 %v2303_v40, %v849_v50  ;;  %v952_v61 = vadd.f32 %v2303_v40, %v881_v51  ;;  %v1947_v62 = vpop.f32.mrf.mxu0  ;;  %v1979_v63 = vpop.f32.mrf.mxu1  ;;  %v979_v0 = vmax.f32 %v915_v54, 0.0 }
  0xf5   : > { %v1011_v1 = vmax.f32 %v947_v55, 0.0  ;;  %v918_v2 = vadd.f32 %v2303_v40, %v847_v56  ;;  %v950_v3 = vadd.f32 %v2303_v40, %v879_v57  ;;  %v1045_v6 = vmin.f32 %v981_v58, 6.0 }
  0xf6   : > { %v1077_v7 = vmin.f32 %v1013_v59, 6.0  ;;  %v612_v8 = vpop.f32.mrf.mxu0  ;;  %v740_v9 = vpop.f32.mrf.mxu1  ;;  %v1074_v11 = vmin.f32 %v1010_v45, 6.0  ;;  %v1043_v12 = vmin.f32 %v979_v0, 6.0  ;;  %v984_v16 = vmax.f32 %v920_v60, 0.0 }
  0xf7   : > { %v1075_v13 = vmin.f32 %v1011_v1, 6.0  ;;  %v1725_v14 = vpack.c.bf16 %v1045_v6, %v1044_v4  ;;  %v1016_v17 = vmax.f32 %v952_v61, 0.0  ;;  %v982_v22 = vmax.f32 %v918_v2, 0.0 }
  0xf8   : > { %v1805_v15 = vpack.c.bf16 %v1077_v7, %v1076_v5  ;;  %v1950_v18 = vpop.f32.mrf.mxu0  ;;  %v1982_v19 = vpop.f32.mrf.mxu1  ;;  %v1720_v20 = vpack.c.bf16 %v1043_v12, %v1042_v10  ;;  %v1014_v23 = vmax.f32 %v950_v3, 0.0  ;;  %v850_v24 = vmul.f32 %v1947_v62, %v2298_v38 }
  0xf9   : > { %v1800_v21 = vpack.c.bf16 %v1075_v13, %v1074_v11  ;;  %1869 = vst [vmem:[%s2332_s22 + $0x18] sm:$0xff] %v1725_v14   ;;  %v882_v25 = vmul.f32 %v1979_v63, %v2298_v38  ;;  %v848_v26 = vmul.f32 %v2298_v38, %v612_v8  ;;  %v880_v27 = vmul.f32 %v2298_v38, %v740_v9 }
  0xfa   : > { %1885 = vst [vmem:[%s2332_s22 + $0x98] sm:$0xff] %v1805_v15   ;;  %v625_v28 = vpop.f32.mrf.mxu0  ;;  %v753_v29 = vpop.f32.mrf.mxu1  ;;  %1868 = vst [vmem:[%s2332_s22 + $0x10] sm:$0xff] %v1720_v20   ;;  %v853_v30 = vmul.f32 %v1950_v18, %v2298_v38  ;;  %v885_v31 = vmul.f32 %v1982_v19, %v2298_v38  ;;  %v921_v34 = vadd.f32 %v2303_v40, %v850_v24  ;;  %v1048_v52 = vmin.f32 %v984_v16, 6.0 }
  0xfb   : > { %1884 = vst [vmem:[%s2332_s22 + $0x90] sm:$0xff] %v1800_v21   ;;  %v851_v32 = vmul.f32 %v2298_v38, %v625_v28  ;;  %v883_v33 = vmul.f32 %v2298_v38, %v753_v29  ;;  %v953_v35 = vadd.f32 %v2303_v40, %v882_v25  ;;  %v919_v36 = vadd.f32 %v2303_v40, %v848_v26 }
  0xfc   : > { %v951_v37 = vadd.f32 %v2303_v40, %v880_v27  ;;  %v1951_v39 = vpop.f32.mrf.mxu0  ;;  %v1983_v41 = vpop.f32.mrf.mxu1  ;;  %v924_v42 = vadd.f32 %v2303_v40, %v853_v30  ;;  %v956_v43 = vadd.f32 %v2303_v40, %v885_v31  ;;  %v985_v46 = vmax.f32 %v921_v34, 0.0 }
  0xfd   : > { %v922_v44 = vadd.f32 %v2303_v40, %v851_v32  ;;  %v954_v45 = vadd.f32 %v2303_v40, %v883_v33  ;;  %v1017_v47 = vmax.f32 %v953_v35, 0.0  ;;  %v983_v48 = vmax.f32 %v919_v36, 0.0 }
  0xfe   : > { %v1015_v49 = vmax.f32 %v951_v37, 0.0  ;;  %v628_v50 = vpop.f32.mrf.mxu0  ;;  %v756_v51 = vpop.f32.mrf.mxu1  ;;  %v1080_v53 = vmin.f32 %v1016_v17, 6.0  ;;  %v1046_v54 = vmin.f32 %v982_v22, 6.0  ;;  %v1078_v55 = vmin.f32 %v1014_v23, 6.0 }
  0xff   : > { %v1049_v56 = vmin.f32 %v985_v46, 6.0  ;;  %v1081_v57 = vmin.f32 %v1017_v47, 6.0  ;;  %v1047_v58 = vmin.f32 %v983_v48, 6.0  ;;  %v988_v62 = vmax.f32 %v924_v42, 0.0 }
 0x100   : > { %v1079_v59 = vmin.f32 %v1015_v49, 6.0  ;;  %v1954_v60 = vpop.f32.mrf.mxu0  ;;  %v1986_v61 = vpop.f32.mrf.mxu1  ;;  %v1020_v63 = vmax.f32 %v956_v43, 0.0  ;;  %v986_v0 = vmax.f32 %v922_v44, 0.0  ;;  %v1018_v1 = vmax.f32 %v954_v45, 0.0 }
 0x101   : > { %v1735_v2 = vpack.c.bf16 %v1049_v56, %v1048_v52  ;;  %v1815_v3 = vpack.c.bf16 %v1081_v57, %v1080_v53  ;;  %v1730_v4 = vpack.c.bf16 %v1047_v58, %v1046_v54  ;;  %v854_v8 = vmul.f32 %v1951_v39, %v2298_v38 }
 0x102   : > { %v1810_v5 = vpack.c.bf16 %v1079_v59, %v1078_v55  ;;  %v641_v6 = vpop.f32.mrf.mxu0  ;;  %v769_v7 = vpop.f32.mrf.mxu1  ;;  %v886_v9 = vmul.f32 %v1983_v41, %v2298_v38  ;;  %v852_v10 = vmul.f32 %v2298_v38, %v628_v50  ;;  %v884_v11 = vmul.f32 %v2298_v38, %v756_v51 }
 0x103   : > { %1871 = vst [vmem:[%s2332_s22 + $0x28] sm:$0xff] %v1735_v2   ;;  %1887 = vst [vmem:[%s2332_s22 + $0xa8] sm:$0xff] %v1815_v3   ;;  %v857_v12 = vmul.f32 %v1954_v60, %v2298_v38  ;;  %v889_v13 = vmul.f32 %v1986_v61, %v2298_v38  ;;  %v855_v14 = vmul.f32 %v2298_v38, %v641_v6  ;;  %v1052_v32 = vmin.f32 %v988_v62, 6.0 }
 0x104   : > { %1870 = vst [vmem:[%s2332_s22 + $0x20] sm:$0xff] %v1730_v4   ;;  %1886 = vst [vmem:[%s2332_s22 + $0xa0] sm:$0xff] %v1810_v5   ;;  %v887_v15 = vmul.f32 %v2298_v38, %v769_v7  ;;  %v1955_v16 = vpop.f32.mrf.mxu0  ;;  %v1987_v17 = vpop.f32.mrf.mxu1  ;;  %v925_v18 = vadd.f32 %v2303_v40, %v854_v8  ;;  %v957_v19 = vadd.f32 %v2303_v40, %v886_v9  ;;  %v1084_v33 = vmin.f32 %v1020_v63, 6.0 }
 0x105   : > { %v923_v20 = vadd.f32 %v2303_v40, %v852_v10  ;;  %v955_v21 = vadd.f32 %v2303_v40, %v884_v11  ;;  %v928_v22 = vadd.f32 %v2303_v40, %v857_v12  ;;  %v960_v23 = vadd.f32 %v2303_v40, %v889_v13 }
 0x106   : > { %v926_v24 = vadd.f32 %v2303_v40, %v855_v14  ;;  %v958_v25 = vadd.f32 %v2303_v40, %v887_v15  ;;  %v644_v26 = vpop.f32.mrf.mxu0  ;;  %v772_v27 = vpop.f32.mrf.mxu1  ;;  %v989_v28 = vmax.f32 %v925_v18, 0.0  ;;  %v1021_v29 = vmax.f32 %v957_v19, 0.0 }
 0x107   : > { %v987_v30 = vmax.f32 %v923_v20, 0.0  ;;  %v1019_v31 = vmax.f32 %v955_v21, 0.0  ;;  %v1050_v34 = vmin.f32 %v986_v0, 6.0  ;;  %v1082_v35 = vmin.f32 %v1018_v1, 6.0 }
 0x108   : > { %v1958_v36 = vpop.f32.mrf.mxu0  ;;  %v1990_v37 = vpop.f32.mrf.mxu1  ;;  %v1053_v39 = vmin.f32 %v989_v28, 6.0  ;;  %v1085_v41 = vmin.f32 %v1021_v29, 6.0  ;;  %v992_v44 = vmax.f32 %v928_v22, 0.0  ;;  %v1024_v45 = vmax.f32 %v960_v23, 0.0 }
 0x109   : > { %v1051_v42 = vmin.f32 %v987_v30, 6.0  ;;  %v1083_v43 = vmin.f32 %v1019_v31, 6.0  ;;  %v990_v46 = vmax.f32 %v926_v24, 0.0  ;;  %v1022_v47 = vmax.f32 %v958_v25, 0.0 }
 0x10a   : > { %v657_v48 = vpop.f32.mrf.mxu0  ;;  %v785_v49 = vpop.f32.mrf.mxu1  ;;  %v1745_v50 = vpack.c.bf16 %v1053_v39, %v1052_v32  ;;  %v1825_v51 = vpack.c.bf16 %v1085_v41, %v1084_v33  ;;  %v858_v54 = vmul.f32 %v1955_v16, %v2298_v38  ;;  %v890_v55 = vmul.f32 %v1987_v17, %v2298_v38 }
 0x10b   : > { %v1740_v52 = vpack.c.bf16 %v1051_v42, %v1050_v34  ;;  %v1820_v53 = vpack.c.bf16 %v1083_v43, %v1082_v35  ;;  %v856_v56 = vmul.f32 %v2298_v38, %v644_v26  ;;  %v888_v57 = vmul.f32 %v2298_v38, %v772_v27 }
 0x10c   : > { %v1959_v58 = vpop.f32.mrf.mxu0  ;;  %v1991_v59 = vpop.f32.mrf.mxu1  ;;  %1873 = vst [vmem:[%s2332_s22 + $0x38] sm:$0xff] %v1745_v50   ;;  %1889 = vst [vmem:[%s2332_s22 + $0xb8] sm:$0xff] %v1825_v51   ;;  %v861_v60 = vmul.f32 %v1958_v36, %v2298_v38  ;;  %v893_v61 = vmul.f32 %v1990_v37, %v2298_v38  ;;  %v859_v62 = vmul.f32 %v2298_v38, %v657_v48  ;;  %v1056_v16 = vmin.f32 %v992_v44, 6.0 }
 0x10d   : > { %1872 = vst [vmem:[%s2332_s22 + $0x30] sm:$0xff] %v1740_v52   ;;  %1888 = vst [vmem:[%s2332_s22 + $0xb0] sm:$0xff] %v1820_v53   ;;  %v891_v63 = vmul.f32 %v2298_v38, %v785_v49  ;;  %v929_v0 = vadd.f32 %v2303_v40, %v858_v54  ;;  %v961_v1 = vadd.f32 %v2303_v40, %v890_v55  ;;  %v1088_v17 = vmin.f32 %v1024_v45, 6.0 }
 0x10e   : > { %v927_v2 = vadd.f32 %v2303_v40, %v856_v56  ;;  %v959_v3 = vadd.f32 %v2303_v40, %v888_v57  ;;  %v660_v4 = vpop.f32.mrf.mxu0  ;;  %v788_v5 = vpop.f32.mrf.mxu1  ;;  %v932_v6 = vadd.f32 %v2303_v40, %v861_v60  ;;  %v964_v7 = vadd.f32 %v2303_v40, %v893_v61 }
 0x10f   : > { %v930_v8 = vadd.f32 %v2303_v40, %v859_v62  ;;  %v962_v9 = vadd.f32 %v2303_v40, %v891_v63  ;;  %v993_v10 = vmax.f32 %v929_v0, 0.0  ;;  %v1025_v11 = vmax.f32 %v961_v1, 0.0 }
 0x110   : > { %v991_v12 = vmax.f32 %v927_v2, 0.0  ;;  %v1023_v13 = vmax.f32 %v959_v3, 0.0  ;;  %v1962_v14 = vpop.f32.mrf.mxu0  ;;  %v1994_v15 = vpop.f32.mrf.mxu1  ;;  %v1054_v18 = vmin.f32 %v990_v46, 6.0  ;;  %v1086_v19 = vmin.f32 %v1022_v47, 6.0 }
 0x111   : > { %v1057_v20 = vmin.f32 %v993_v10, 6.0  ;;  %v1089_v21 = vmin.f32 %v1025_v11, 6.0  ;;  %v996_v26 = vmax.f32 %v932_v6, 0.0  ;;  %v1028_v27 = vmax.f32 %v964_v7, 0.0 }
 0x112   : > { %v1055_v22 = vmin.f32 %v991_v12, 6.0  ;;  %v1087_v23 = vmin.f32 %v1023_v13, 6.0  ;;  %v673_v24 = vpop.f32.mrf.mxu0  ;;  %v801_v25 = vpop.f32.mrf.mxu1  ;;  %v994_v28 = vmax.f32 %v930_v8, 0.0  ;;  %v1026_v29 = vmax.f32 %v962_v9, 0.0 }
 0x113   : > { %v1755_v30 = vpack.c.bf16 %v1057_v20, %v1056_v16  ;;  %v1835_v31 = vpack.c.bf16 %v1089_v21, %v1088_v17  ;;  %v862_v36 = vmul.f32 %v1959_v58, %v2298_v38  ;;  %v894_v37 = vmul.f32 %v1991_v59, %v2298_v38 }
 0x114   : > { %v1750_v32 = vpack.c.bf16 %v1055_v22, %v1054_v18  ;;  %v1830_v33 = vpack.c.bf16 %v1087_v23, %v1086_v19  ;;  %v1963_v34 = vpop.f32.mrf.mxu0  ;;  %v1995_v35 = vpop.f32.mrf.mxu1  ;;  %v860_v39 = vmul.f32 %v2298_v38, %v660_v4  ;;  %v892_v41 = vmul.f32 %v2298_v38, %v788_v5 }
 0x115   : > { %1875 = vst [vmem:[%s2332_s22 + $0x48] sm:$0xff] %v1755_v30   ;;  %1891 = vst [vmem:[%s2332_s22 + $0xc8] sm:$0xff] %v1835_v31   ;;  %v865_v42 = vmul.f32 %v1962_v14, %v2298_v38  ;;  %v897_v43 = vmul.f32 %v1994_v15, %v2298_v38  ;;  %v863_v44 = vmul.f32 %v2298_v38, %v673_v24  ;;  %v1060_v62 = vmin.f32 %v996_v26, 6.0 }
 0x116   : > { %1874 = vst [vmem:[%s2332_s22 + $0x40] sm:$0xff] %v1750_v32   ;;  %1890 = vst [vmem:[%s2332_s22 + $0xc0] sm:$0xff] %v1830_v33   ;;  %v895_v45 = vmul.f32 %v2298_v38, %v801_v25  ;;  %v676_v46 = vpop.f32.mrf.mxu0  ;;  %v804_v47 = vpop.f32.mrf.mxu1  ;;  %v933_v48 = vadd.f32 %v2303_v40, %v862_v36  ;;  %v965_v49 = vadd.f32 %v2303_v40, %v894_v37  ;;  %v1092_v63 = vmin.f32 %v1028_v27, 6.0 }
 0x117   : > { %v931_v50 = vadd.f32 %v2303_v40, %v860_v39  ;;  %v963_v51 = vadd.f32 %v2303_v40, %v892_v41  ;;  %v936_v52 = vadd.f32 %v2303_v40, %v865_v42  ;;  %v968_v53 = vadd.f32 %v2303_v40, %v897_v43 }
 0x118   : > { %v934_v54 = vadd.f32 %v2303_v40, %v863_v44  ;;  %v966_v55 = vadd.f32 %v2303_v40, %v895_v45  ;;  %v1966_v56 = vpop.f32.mrf.mxu0  ;;  %v1998_v57 = vpop.f32.mrf.mxu1  ;;  %v997_v58 = vmax.f32 %v933_v48, 0.0  ;;  %v1029_v59 = vmax.f32 %v965_v49, 0.0 }
 0x119   : > { %v995_v60 = vmax.f32 %v931_v50, 0.0  ;;  %v1027_v61 = vmax.f32 %v963_v51, 0.0  ;;  %v1058_v0 = vmin.f32 %v994_v28, 6.0  ;;  %v1090_v1 = vmin.f32 %v1026_v29, 6.0 }
 0x11a   : > { %v1061_v2 = vmin.f32 %v997_v58, 6.0  ;;  %v1093_v3 = vmin.f32 %v1029_v59, 6.0  ;;  %v1000_v6 = vmax.f32 %v936_v52, 0.0  ;;  %v1032_v7 = vmax.f32 %v968_v53, 0.0  ;;  %v689_v10 = vpop.f32.mrf.mxu0  ;;  %v817_v11 = vpop.f32.mrf.mxu1 }
 0x11b   : > { %v1059_v4 = vmin.f32 %v995_v60, 6.0  ;;  %v1091_v5 = vmin.f32 %v1027_v61, 6.0  ;;  %v998_v8 = vmax.f32 %v934_v54, 0.0  ;;  %v1030_v9 = vmax.f32 %v966_v55, 0.0 }
 0x11c   : > { %v1765_v12 = vpack.c.bf16 %v1061_v2, %v1060_v62  ;;  %v1845_v13 = vpack.c.bf16 %v1093_v3, %v1092_v63  ;;  %v866_v16 = vmul.f32 %v1963_v34, %v2298_v38  ;;  %v898_v17 = vmul.f32 %v1995_v35, %v2298_v38  ;;  %v1967_v28 = vpop.f32.mrf.mxu0  ;;  %v1999_v29 = vpop.f32.mrf.mxu1 }
 0x11d   : > { %v1760_v14 = vpack.c.bf16 %v1059_v4, %v1058_v0  ;;  %v1840_v15 = vpack.c.bf16 %v1091_v5, %v1090_v1  ;;  %v864_v18 = vmul.f32 %v2298_v38, %v676_v46  ;;  %v896_v19 = vmul.f32 %v2298_v38, %v804_v47 }
 0x11e   : > { %1877 = vst [vmem:[%s2332_s22 + $0x58] sm:$0xff] %v1765_v12   ;;  %1893 = vst [vmem:[%s2332_s22 + $0xd8] sm:$0xff] %v1845_v13   ;;  %v869_v20 = vmul.f32 %v1966_v56, %v2298_v38  ;;  %v901_v21 = vmul.f32 %v1998_v57, %v2298_v38  ;;  %v867_v22 = vmul.f32 %v2298_v38, %v689_v10  ;;  %v1064_v30 = vmin.f32 %v1000_v6, 6.0  ;;  %v692_v48 = vpop.f32.mrf.mxu0  ;;  %v820_v49 = vpop.f32.mrf.mxu1 }
 0x11f   : > { %1876 = vst [vmem:[%s2332_s22 + $0x50] sm:$0xff] %v1760_v14   ;;  %1892 = vst [vmem:[%s2332_s22 + $0xd0] sm:$0xff] %v1840_v15   ;;  %v899_v23 = vmul.f32 %v2298_v38, %v817_v11  ;;  %v937_v24 = vadd.f32 %v2303_v40, %v866_v16  ;;  %v969_v25 = vadd.f32 %v2303_v40, %v898_v17  ;;  %v1096_v31 = vmin.f32 %v1032_v7, 6.0 }
 0x120   : > { %v935_v26 = vadd.f32 %v2303_v40, %v864_v18  ;;  %v967_v27 = vadd.f32 %v2303_v40, %v896_v19  ;;  %v1062_v32 = vmin.f32 %v998_v8, 6.0  ;;  %v1094_v33 = vmin.f32 %v1030_v9, 6.0 }
 0x121   : > { %v1001_v34 = vmax.f32 %v937_v24, 0.0  ;;  %v1033_v35 = vmax.f32 %v969_v25, 0.0  ;;  %v940_v39 = vadd.f32 %v2303_v40, %v869_v20  ;;  %v972_v41 = vadd.f32 %v2303_v40, %v901_v21 }
 0x122   : > { %v999_v36 = vmax.f32 %v935_v26, 0.0  ;;  %v1031_v37 = vmax.f32 %v967_v27, 0.0  ;;  %v938_v42 = vadd.f32 %v2303_v40, %v867_v22  ;;  %v970_v43 = vadd.f32 %v2303_v40, %v899_v23 }
 0x123   : > { %v1065_v44 = vmin.f32 %v1001_v34, 6.0  ;;  %v1097_v45 = vmin.f32 %v1033_v35, 6.0  ;;  %v870_v54 = vmul.f32 %v1967_v28, %v2298_v38  ;;  %v902_v55 = vmul.f32 %v1999_v29, %v2298_v38 }
 0x124   : > { %v1063_v46 = vmin.f32 %v999_v36, 6.0  ;;  %v1095_v47 = vmin.f32 %v1031_v37, 6.0  ;;  %v868_v56 = vmul.f32 %v2298_v38, %v692_v48  ;;  %v900_v57 = vmul.f32 %v2298_v38, %v820_v49 }
 0x125   : > { %v1775_v50 = vpack.c.bf16 %v1065_v44, %v1064_v30  ;;  %v1855_v51 = vpack.c.bf16 %v1097_v45, %v1096_v31  ;;  %v1004_v58 = vmax.f32 %v940_v39, 0.0  ;;  %v1036_v59 = vmax.f32 %v972_v41, 0.0 }
 0x126   : > { %v1770_v52 = vpack.c.bf16 %v1063_v46, %v1062_v32  ;;  %v1850_v53 = vpack.c.bf16 %v1095_v47, %v1094_v33  ;;  %v1002_v60 = vmax.f32 %v938_v42, 0.0  ;;  %v1034_v61 = vmax.f32 %v970_v43, 0.0 }
 0x127   : > { %1879 = vst [vmem:[%s2332_s22 + $0x68] sm:$0xff] %v1775_v50   ;;  %1895 = vst [vmem:[%s2332_s22 + $0xe8] sm:$0xff] %v1855_v51   ;;  %v941_v62 = vadd.f32 %v2303_v40, %v870_v54  ;;  %v973_v63 = vadd.f32 %v2303_v40, %v902_v55  ;;  %v939_v0 = vadd.f32 %v2303_v40, %v868_v56  ;;  %v1068_v5 = vmin.f32 %v1004_v58, 6.0 }
 0x128   : > { %1878 = vst [vmem:[%s2332_s22 + $0x60] sm:$0xff] %v1770_v52   ;;  %1894 = vst [vmem:[%s2332_s22 + $0xe0] sm:$0xff] %v1850_v53   ;;  %v971_v1 = vadd.f32 %v2303_v40, %v900_v57  ;;  %v1100_v6 = vmin.f32 %v1036_v59, 6.0  ;;  %v1066_v7 = vmin.f32 %v1002_v60, 6.0  ;;  %v1098_v8 = vmin.f32 %v1034_v61, 6.0 }
 0x129   : > { %v1005_v2 = vmax.f32 %v941_v62, 0.0  ;;  %v1037_v38 = vmax.f32 %v973_v63, 0.0  ;;  %v1003_v3 = vmax.f32 %v939_v0, 0.0 }
 0x12a   : > { %v1035_v4 = vmax.f32 %v971_v1, 0.0 }
 0x12b   : > { %v1069_v9 = vmin.f32 %v1005_v2, 6.0  ;;  %v1101_v10 = vmin.f32 %v1037_v38, 6.0  ;;  %v1067_v11 = vmin.f32 %v1003_v3, 6.0 }
 0x12c   : > { %v1099_v40 = vmin.f32 %v1035_v4, 6.0 }
 0x12d   : > { %v1785_v12 = vpack.c.bf16 %v1069_v9, %v1068_v5  ;;  %v1865_v13 = vpack.c.bf16 %v1101_v10, %v1100_v6  ;;  %v1780_v14 = vpack.c.bf16 %v1067_v11, %v1066_v7 }
 0x12e   : > { %v1860_v15 = vpack.c.bf16 %v1099_v40, %v1098_v8 }
 0x12f   : > { %1881 = vst [vmem:[%s2332_s22 + $0x78] sm:$0xff] %v1785_v12   ;;  %1897 = vst [vmem:[%s2332_s22 + $0xf8] sm:$0xff] %v1865_v13  }
 0x130   : > { %1880 = vst [vmem:[%s2332_s22 + $0x70] sm:$0xff] %v1780_v14   ;;  %1896 = vst [vmem:[%s2332_s22 + $0xf0] sm:$0xff] %v1860_v15  }
 0x131   : > { %2093 = shalt.err (!%p2090_p3)
}
 0x132   : > { %s2094_s9 = scalar_lea.hbm %s2471_s30, 4096  ;;  %s2098_s12 = scalar_lea.hbm %s2525_s4, 8192 }
 0x133   : > { %p2095_p4 = scmp.ne.s32.totalorder %s2471_s30, %s2094_s9  ;;  %p2099_p9 = scmp.lt.s32.totalorder %s2471_s30, %s2525_s4 }
 0x134   : > { %p2100_p10 = scmp.lt.s32.totalorder %s2098_s12, %s2094_s9 }
 0x135   : > { %p2096_p7 = pnand %p2095_p4, %p2209_p5 }
 0x136   : > { %p2101_p11 = por %p2100_p10, %p2099_p9 }
 0x137   : > { %p2097_p8 = pneg %p2096_p7 }
 0x139   : > { %p2102_p12 = pnand %p2101_p11, %p2097_p8 }
 0x13b   : > { %2105 = shalt.err (!%p2102_p12)
}
 0x13c   : > { %s2144_s20 = smov 64   ;;  %s2145_s22 = smov 4  }
 0x13d   : > { %2004 = dma.vmem_to_hbm [thread:$0]  (%p2209_p5), %s2473_s27, 4096, %s2471_s30, %s2481_s19, %s2144_s20, %s2144_s20, %s2145_s22  }
 0x13e PF: > { %p2010_p13 = scmp.ge.s32.totalorder %s2140_s18, 2  ;;  %s1451_s23 = sand.u32 1, %s2128_s15  }
 0x13f   : > { %s1452_s28 = scalar_lea.sflag [#allocation3], %s1451_s23 }
 0x140   : > { %p2007_p0 = pnand %p2010_p13, %p2213_p6 }
 0x142   : > { %p2008_p1 = pneg %p2007_p0 }
 0x144   : > { %2123 = dma.done.wait (%p2008_p1), %s1452_s28, 4096  }
 0x145   : > { %2125 = vsyncadd (%p2008_p1), %s1452_s28, 4294963200  ;;  %p14_p2 = scmp.ge.s32.totalorder %s2196_s21, 4   ;;  %s2528_s15 = smov %s2132_s16 }
 0x146   : > { %s2529_s16 = smov %s2136_s17  ;;  %s2530_s17 = smov %s2207_s24 }
 0x147   : > { %s2531_s18 = smov %s2196_s21  ;;  %16 = sbr.rel (!%p14_p2) target bundleno = 3 (0x3), region = 71 }
 0x14c   :  { %1457 = vsyncpa [#allocation3], 1 }
 0x14d   :  { %1459 = vsyncpa [#allocation3 + $0x1], 1 }

</bundles_post_ra>
